<compile_context>
chip_gen: v5e
topology: v5e:2x2
jax: 0.10.0
libtpu: 0.0.40
codegen_flags: <defaults>
</compile_context>

<pallas_src>
import jax
import jax.numpy as jnp
from jax.experimental import pallas as pl
from jax.experimental.pallas import tpu as pltpu


def _round_up(a, b):
    return (a + b - 1) // b * b


def _vae_forward_kernel(
    x_ref, eps_ref,
    w1_ref, b1_ref,
    wlat_ref, blat_ref,
    w2_ref, b2_ref,
    wout_ref, bout_ref,
    recon_ref, lat_ref,
):
    rep = eps_ref.shape[1]

    x = x_ref[...]                       # (TB, D_in) bf16
    eps = eps_ref[...]                   # (TB, R)    f32

    # ---- encode: hidden layer (bf16 MXU inputs, f32 accumulate) ----
    h = jnp.dot(x, w1_ref[...], preferred_element_type=jnp.float32) + b1_ref[...]
    h = jnp.maximum(h, 0.0)                                   # ReLU in f32 (VPU)

    # ---- fused mu/logvar head: single (hidden, 2R) matmul ----
    lat = jnp.dot(h.astype(jnp.bfloat16), wlat_ref[...],
                  preferred_element_type=jnp.float32) + blat_ref[...]
    mu = lat[:, :rep]
    logvar = lat[:, rep:]

    # ---- reparameterize: z = mu + eps * exp(0.5 * logvar)  (f32 EUP/VPU) ----
    z = mu + eps * jnp.exp(0.5 * logvar)

    # ---- decode ----
    h2 = jnp.dot(z.astype(jnp.bfloat16), w2_ref[...],
                 preferred_element_type=jnp.float32) + b2_ref[...]
    h2 = jnp.maximum(h2, 0.0)
    logits = jnp.dot(h2.astype(jnp.bfloat16), wout_ref[...],
                     preferred_element_type=jnp.float32) + bout_ref[...]

    recon_ref[...] = jax.nn.sigmoid(logits).astype(recon_ref.dtype)  # Bernoulli mean
    lat_ref[...] = jnp.concatenate([lat, z], axis=-1)                # [mu | logvar | z]


def vae_forward_pallas(x_nchw, eps, params, *, batch_tile=1024,
                       recon_dtype=jnp.bfloat16):
    """VAE forward. Returns (recon, obs_params, (mu, logvar), z) — the module's
    forward() 3-tuple plus the sampled latents z (extra, for testing)."""
    B = x_nchw.shape[0]
    x = x_nchw.reshape(B, -1).astype(jnp.bfloat16)   # flatten NCHW -> (B, C*H*W)
    d_in = x.shape[1]
    hidden = params["w1"].shape[1]
    rep = params["wmu"].shape[1]

    # Fuse the two encoder heads into one weight / bias.
    wlat = jnp.concatenate([params["wmu"], params["wlv"]], axis=1)
    blat = jnp.concatenate([params["bmu"], params["blv"]], axis=1).astype(jnp.float32)

    # bf16 weights for the MXU; biases stay f32 (elementwise path).
    w1 = params["w1"].astype(jnp.bfloat16)
    wlat = wlat.astype(jnp.bfloat16)
    w2 = params["w2"].astype(jnp.bfloat16)
    wout = params["wout"].astype(jnp.bfloat16)
    b1 = params["b1"].astype(jnp.float32)
    b2 = params["b2"].astype(jnp.float32)
    bout = params["bout"].astype(jnp.float32)
    eps = eps.astype(jnp.float32)

    # Batch tiling: pad to a multiple of 8 (sublane) and of the batch tile.
    # If the whole (padded) batch fits in <= 2 tiles, split it in two so the grid
    # has >= 2 steps and the "parallel" axis can use both TensorCores on v7x.
    b8 = _round_up(B, 8)
    if 16 <= b8 <= 2 * batch_tile:
        tb = _round_up((b8 + 1) // 2, 8)
    else:
        tb = min(batch_tile, b8)
    b_pad = _round_up(b8, tb)
    if b_pad != B:
        x = jnp.pad(x, ((0, b_pad - B), (0, 0)))
        eps = jnp.pad(eps, ((0, b_pad - B), (0, 0)))

    grid = (b_pad // tb,)

    def batch_spec(cols):
        return pl.BlockSpec((tb, cols), lambda i: (i, 0))

    def resident(shape):                 # weights stay VMEM-resident across steps
        return pl.BlockSpec(shape, lambda i: (0, 0), pipeline_mode=pl.Buffered(1))

    out_shapes = (
        jax.ShapeDtypeStruct((b_pad, d_in), recon_dtype),       # recon (bf16 by default)
        jax.ShapeDtypeStruct((b_pad, 3 * rep), jnp.float32),    # mu || logvar || z
    )

    weight_elems = d_in * hidden + hidden * 2 * rep + rep * hidden + hidden * d_in
    flops = 2 * b_pad * weight_elems
    transcendentals = b_pad * (rep + d_in)                      # exp + sigmoid
    recon_bytes = jnp.dtype(recon_dtype).itemsize
    bytes_accessed = (
        2 * b_pad * d_in + 4 * b_pad * rep                      # x (bf16), eps (f32)
        + 2 * weight_elems                                      # bf16 weights
        + 4 * (2 * hidden + 2 * rep + d_in)                     # f32 biases
        + recon_bytes * b_pad * d_in                            # recon
        + 4 * b_pad * 3 * rep                                   # packed latents
    )

    kernel = pl.pallas_call(
        _vae_forward_kernel,
        out_shape=out_shapes,
        grid_spec=pltpu.PrefetchScalarGridSpec(
            num_scalar_prefetch=0,
            grid=grid,
            in_specs=[
                batch_spec(d_in),                # x
                batch_spec(rep),                 # eps
                resident((d_in, hidden)),        # w1
                resident((1, hidden)),           # b1
                resident((hidden, 2 * rep)),     # wlat (wmu || wlv)
                resident((1, 2 * rep)),          # blat
                resident((rep, hidden)),         # w2
                resident((1, hidden)),           # b2
                resident((hidden, d_in)),        # wout
                resident((1, d_in)),             # bout
            ],
            out_specs=[
                batch_spec(d_in),                # recon
                batch_spec(3 * rep),             # mu || logvar || z
            ],
        ),
        compiler_params=pltpu.CompilerParams(
            dimension_semantics=("parallel",),   # batch-parallel (2 TCs on v7x)
            vmem_limit_bytes=48 * 1024 * 1024,   # > v5e 16 MiB scoped default, < v7x 64 MiB
        ),
        cost_estimate=pl.CostEstimate(
            flops=int(flops),
            transcendentals=int(transcendentals),
            bytes_accessed=int(bytes_accessed),
        ),
    )

    recon, latpacked = kernel(x, eps, w1, b1, wlat, blat, w2, b2, wout, bout)

    recon = recon[:B]
    mu = latpacked[:B, :rep]
    logvar = latpacked[:B, rep:2 * rep]
    z = latpacked[:B, 2 * rep:]

    obs_distribution_params = recon              # Bernoulli decoder
    latent_distribution_params = (mu, logvar)
    return recon, obs_distribution_params, latent_distribution_params, z


def init_params(key, d_in, hidden, rep):
    ks = jax.random.split(key, 6)

    def dense(k, fan_in, fan_out):
        scale = 1.0 / jnp.sqrt(jnp.float32(fan_in))
        return (jax.random.uniform(k, (fan_in, fan_out), jnp.float32, -scale, scale),
                jnp.zeros((1, fan_out), jnp.float32))

    w1, b1 = dense(ks[0], d_in, hidden)
    wmu, bmu = dense(ks[1], hidden, rep)
    wlv, blv = dense(ks[2], hidden, rep)
    w2, b2 = dense(ks[3], rep, hidden)
    wout, bout = dense(ks[4], hidden, d_in)
    return dict(w1=w1, b1=b1, wmu=wmu, bmu=bmu, wlv=wlv, blv=blv,
                w2=w2, b2=b2, wout=wout, bout=bout)


def vae_forward_ref(x_nchw, eps, params):
    """Pure-JAX reference with matching bf16-matmul / f32-accumulate numerics."""
    B = x_nchw.shape[0]
    x = x_nchw.reshape(B, -1)

    def mm(a, w):
        return jnp.dot(a.astype(jnp.bfloat16), w.astype(jnp.bfloat16),
                       preferred_element_type=jnp.float32)

    h = jnp.maximum(mm(x, params["w1"]) + params["b1"], 0.0)
    mu = mm(h, params["wmu"]) + params["bmu"]
    logvar = mm(h, params["wlv"]) + params["blv"]
    z = mu + eps * jnp.exp(0.5 * logvar)
    h2 = jnp.maximum(mm(z, params["w2"]) + params["b2"], 0.0)
    recon = jax.nn.sigmoid(mm(h2, params["wout"]) + params["bout"])
    return recon, mu, logvar, z


if __name__ == "__main__":
    key = jax.random.PRNGKey(0)
    k_x, k_eps, k_p = jax.random.split(key, 3)

    B, C, H, W = 2, 4, 16, 16          # NCHW input, consistent with conv-VAE usage
    d_in = C * H * W                   # 1024
    hidden = 32
    representation_size = 8

    x = jax.random.uniform(k_x, (B, C, H, W), jnp.float32)
    eps = jax.random.normal(k_eps, (B, representation_size), jnp.float32)
    params = init_params(k_p, d_in, hidden, representation_size)

    recon, obs_params, (mu, logvar), z = vae_forward_pallas(x, eps, params)
    jax.block_until_ready(recon)

    # Correctness check against a pure-JAX reference (same bf16/f32 mixed precision;
    # recon is bf16 so compare with a bf16-level tolerance).
    r_ref, mu_ref, lv_ref, z_ref = vae_forward_ref(x, eps, params)
    assert recon.shape == (B, d_in) and mu.shape == (B, representation_size)
    assert jnp.allclose(recon.astype(jnp.float32), r_ref, atol=1e-2, rtol=1e-2), "recon mismatch"
    assert jnp.allclose(mu, mu_ref, atol=2e-3, rtol=2e-3), "mu mismatch"
    assert jnp.allclose(logvar, lv_ref, atol=2e-3, rtol=2e-3), "logvar mismatch"
    assert jnp.allclose(z, z_ref, atol=2e-3, rtol=2e-3), "latent mismatch"

    print("KERNEL_OK")
</pallas_src>

<mosaic_0001>
module attributes {stable_mosaic.version = 11 : i64} {
  func.func @_vae_forward_kernel(%arg0: i32, %arg1: memref<8x1024xbf16, #tpu.memory_space<vmem>>, %arg2: memref<8x8xf32, #tpu.memory_space<vmem>>, %arg3: memref<1024x32xbf16, #tpu.memory_space<vmem>>, %arg4: memref<1x32xf32, #tpu.memory_space<vmem>>, %arg5: memref<32x16xbf16, #tpu.memory_space<vmem>>, %arg6: memref<1x16xf32, #tpu.memory_space<vmem>>, %arg7: memref<8x32xbf16, #tpu.memory_space<vmem>>, %arg8: memref<1x32xf32, #tpu.memory_space<vmem>>, %arg9: memref<32x1024xbf16, #tpu.memory_space<vmem>>, %arg10: memref<1x1024xf32, #tpu.memory_space<vmem>>, %arg11: memref<8x1024xbf16, #tpu.memory_space<vmem>>, %arg12: memref<8x24xf32, #tpu.memory_space<vmem>>) attributes {dimension_semantics = [#tpu.dimension_semantics<parallel>], iteration_bounds = array<i64: 1>, scalar_prefetch = 0 : i64, scratch_operands = 0 : i64, tpu.core_type = #tpu.core_type<tc>, window_params = [{transform_indices = @transform_0, window_bounds = array<i64: 8, 1024>}, {transform_indices = @transform_1, window_bounds = array<i64: 8, 8>}, {pipeline_mode = #tpu.pipeline_mode<synchronous>, transform_indices = @transform_2, window_bounds = array<i64: 1024, 32>}, {pipeline_mode = #tpu.pipeline_mode<synchronous>, transform_indices = @transform_3, window_bounds = array<i64: 1, 32>}, {pipeline_mode = #tpu.pipeline_mode<synchronous>, transform_indices = @transform_4, window_bounds = array<i64: 32, 16>}, {pipeline_mode = #tpu.pipeline_mode<synchronous>, transform_indices = @transform_5, window_bounds = array<i64: 1, 16>}, {pipeline_mode = #tpu.pipeline_mode<synchronous>, transform_indices = @transform_6, window_bounds = array<i64: 8, 32>}, {pipeline_mode = #tpu.pipeline_mode<synchronous>, transform_indices = @transform_7, window_bounds = array<i64: 1, 32>}, {pipeline_mode = #tpu.pipeline_mode<synchronous>, transform_indices = @transform_8, window_bounds = array<i64: 32, 1024>}, {pipeline_mode = #tpu.pipeline_mode<synchronous>, transform_indices = @transform_9, window_bounds = array<i64: 1, 1024>}, {transform_indices = @transform_10, window_bounds = array<i64: 8, 1024>}, {transform_indices = @transform_11, window_bounds = array<i64: 8, 24>}]} {
    %c0 = arith.constant 0 : index
    %c0_0 = arith.constant 0 : index
    %0 = vector.load %arg1[%c0, %c0_0] : memref<8x1024xbf16, #tpu.memory_space<vmem>>, vector<8x1024xbf16>
    %c0_1 = arith.constant 0 : index
    %c0_2 = arith.constant 0 : index
    %1 = vector.load %arg2[%c0_1, %c0_2] : memref<8x8xf32, #tpu.memory_space<vmem>>, vector<8x8xf32>
    %c0_3 = arith.constant 0 : index
    %c0_4 = arith.constant 0 : index
    %2 = vector.load %arg3[%c0_3, %c0_4] : memref<1024x32xbf16, #tpu.memory_space<vmem>>, vector<1024x32xbf16>
    %cst = arith.constant dense<0.000000e+00> : vector<8x32xf32>
    %3 = tpu.matmul %0, %2, %cst {dimension_numbers = #tpu.dot_dimension_numbers<[1], [0], [0], [1], [0, 0, 1, 1], [], []>} : vector<8x1024xbf16>, vector<1024x32xbf16>, vector<8x32xf32> -> vector<8x32xf32>
    %c0_5 = arith.constant 0 : index
    %c0_6 = arith.constant 0 : index
    %4 = vector.load %arg4[%c0_5, %c0_6] : memref<1x32xf32, #tpu.memory_space<vmem>>, vector<1x32xf32>
    %5 = vector.broadcast %4 : vector<1x32xf32> to vector<8x32xf32>
    %6 = arith.addf %3, %5 : vector<8x32xf32>
    %cst_7 = arith.constant 0.000000e+00 : f32
    %7 = vector.broadcast %cst_7 : f32 to vector<8x32xf32>
    %8 = arith.maximumf %6, %7 : vector<8x32xf32>
    %9 = arith.truncf %8 : vector<8x32xf32> to vector<8x32xbf16>
    %c0_8 = arith.constant 0 : index
    %c0_9 = arith.constant 0 : index
    %10 = vector.load %arg5[%c0_8, %c0_9] : memref<32x16xbf16, #tpu.memory_space<vmem>>, vector<32x16xbf16>
    %cst_10 = arith.constant dense<0.000000e+00> : vector<8x16xf32>
    %11 = tpu.matmul %9, %10, %cst_10 {dimension_numbers = #tpu.dot_dimension_numbers<[1], [0], [0], [1], [0, 0, 1, 1], [], []>} : vector<8x32xbf16>, vector<32x16xbf16>, vector<8x16xf32> -> vector<8x16xf32>
    %c0_11 = arith.constant 0 : index
    %c0_12 = arith.constant 0 : index
    %12 = vector.load %arg6[%c0_11, %c0_12] : memref<1x16xf32, #tpu.memory_space<vmem>>, vector<1x16xf32>
    %13 = vector.broadcast %12 : vector<1x16xf32> to vector<8x16xf32>
    %14 = arith.addf %11, %13 : vector<8x16xf32>
    %15 = vector.extract_strided_slice %14 {offsets = [0, 0], sizes = [8, 8], strides = [1, 1]} : vector<8x16xf32> to vector<8x8xf32>
    %16 = vector.extract_strided_slice %14 {offsets = [0, 8], sizes = [8, 8], strides = [1, 1]} : vector<8x16xf32> to vector<8x8xf32>
    %cst_13 = arith.constant 5.000000e-01 : f32
    %17 = vector.broadcast %cst_13 : f32 to vector<8x8xf32>
    %18 = arith.mulf %17, %16 : vector<8x8xf32>
    %19 = math.exp %18 : vector<8x8xf32>
    %20 = arith.mulf %1, %19 : vector<8x8xf32>
    %21 = arith.addf %15, %20 : vector<8x8xf32>
    %22 = arith.truncf %21 : vector<8x8xf32> to vector<8x8xbf16>
    %c0_14 = arith.constant 0 : index
    %c0_15 = arith.constant 0 : index
    %23 = vector.load %arg7[%c0_14, %c0_15] : memref<8x32xbf16, #tpu.memory_space<vmem>>, vector<8x32xbf16>
    %cst_16 = arith.constant dense<0.000000e+00> : vector<8x32xf32>
    %24 = tpu.matmul %22, %23, %cst_16 {dimension_numbers = #tpu.dot_dimension_numbers<[1], [0], [0], [1], [0, 0, 1, 1], [], []>} : vector<8x8xbf16>, vector<8x32xbf16>, vector<8x32xf32> -> vector<8x32xf32>
    %c0_17 = arith.constant 0 : index
    %c0_18 = arith.constant 0 : index
    %25 = vector.load %arg8[%c0_17, %c0_18] : memref<1x32xf32, #tpu.memory_space<vmem>>, vector<1x32xf32>
    %26 = vector.broadcast %25 : vector<1x32xf32> to vector<8x32xf32>
    %27 = arith.addf %24, %26 : vector<8x32xf32>
    %cst_19 = arith.constant 0.000000e+00 : f32
    %28 = vector.broadcast %cst_19 : f32 to vector<8x32xf32>
    %29 = arith.maximumf %27, %28 : vector<8x32xf32>
    %30 = arith.truncf %29 : vector<8x32xf32> to vector<8x32xbf16>
    %c0_20 = arith.constant 0 : index
    %c0_21 = arith.constant 0 : index
    %31 = vector.load %arg9[%c0_20, %c0_21] : memref<32x1024xbf16, #tpu.memory_space<vmem>>, vector<32x1024xbf16>
    %cst_22 = arith.constant dense<0.000000e+00> : vector<8x1024xf32>
    %32 = tpu.matmul %30, %31, %cst_22 {dimension_numbers = #tpu.dot_dimension_numbers<[1], [0], [0], [1], [0, 0, 1, 1], [], []>} : vector<8x32xbf16>, vector<32x1024xbf16>, vector<8x1024xf32> -> vector<8x1024xf32>
    %c0_23 = arith.constant 0 : index
    %c0_24 = arith.constant 0 : index
    %33 = vector.load %arg10[%c0_23, %c0_24] : memref<1x1024xf32, #tpu.memory_space<vmem>>, vector<1x1024xf32>
    %34 = vector.broadcast %33 : vector<1x1024xf32> to vector<8x1024xf32>
    %35 = arith.addf %32, %34 : vector<8x1024xf32>
    %36 = arith.negf %35 : vector<8x1024xf32>
    %37 = math.exp %36 : vector<8x1024xf32>
    %cst_25 = arith.constant 1.000000e+00 : f32
    %38 = vector.broadcast %cst_25 : f32 to vector<8x1024xf32>
    %39 = arith.addf %38, %37 : vector<8x1024xf32>
    %40 = arith.divf %38, %39 : vector<8x1024xf32>
    %41 = arith.truncf %40 : vector<8x1024xf32> to vector<8x1024xbf16>
    %c0_26 = arith.constant 0 : index
    %c0_27 = arith.constant 0 : index
    %42 = vector.load %arg11[%c0_26, %c0_27] : memref<8x1024xbf16, #tpu.memory_space<vmem>>, vector<8x1024xbf16>
    tpu.vector_store %arg11[%c0_26, %c0_27], %41 {strides = array<i32>} : memref<8x1024xbf16, #tpu.memory_space<vmem>>, vector<8x1024xbf16>,
    %43 = tpu.concatenate %14, %21 in 1 : vector<8x16xf32>, vector<8x8xf32> -> vector<8x24xf32>
    %c0_28 = arith.constant 0 : index
    %c0_29 = arith.constant 0 : index
    %44 = vector.load %arg12[%c0_28, %c0_29] : memref<8x24xf32, #tpu.memory_space<vmem>>, vector<8x24xf32>
    tpu.vector_store %arg12[%c0_28, %c0_29], %43 {strides = array<i32>} : memref<8x24xf32, #tpu.memory_space<vmem>>, vector<8x24xf32>,
    return
  }
  func.func @transform_0(%arg0: i32) -> (i32, i32) {
    %c0_i32 = arith.constant 0 : i32
    %c0_i32_0 = arith.constant 0 : i32
    return %arg0, %c0_i32 : i32, i32
  }
  func.func @transform_1(%arg0: i32) -> (i32, i32) {
    %c0_i32 = arith.constant 0 : i32
    %c0_i32_0 = arith.constant 0 : i32
    return %arg0, %c0_i32 : i32, i32
  }
  func.func @transform_2(%arg0: i32) -> (i32, i32) {
    %c0_i32 = arith.constant 0 : i32
    %c0_i32_0 = arith.constant 0 : i32
    %c0_i32_1 = arith.constant 0 : i32
    return %c0_i32, %c0_i32_0 : i32, i32
  }
  func.func @transform_3(%arg0: i32) -> (i32, i32) {
    %c0_i32 = arith.constant 0 : i32
    %c0_i32_0 = arith.constant 0 : i32
    %c0_i32_1 = arith.constant 0 : i32
    return %c0_i32, %c0_i32_0 : i32, i32
  }
  func.func @transform_4(%arg0: i32) -> (i32, i32) {
    %c0_i32 = arith.constant 0 : i32
    %c0_i32_0 = arith.constant 0 : i32
    %c0_i32_1 = arith.constant 0 : i32
    return %c0_i32, %c0_i32_0 : i32, i32
  }
  func.func @transform_5(%arg0: i32) -> (i32, i32) {
    %c0_i32 = arith.constant 0 : i32
    %c0_i32_0 = arith.constant 0 : i32
    %c0_i32_1 = arith.constant 0 : i32
    return %c0_i32, %c0_i32_0 : i32, i32
  }
  func.func @transform_6(%arg0: i32) -> (i32, i32) {
    %c0_i32 = arith.constant 0 : i32
    %c0_i32_0 = arith.constant 0 : i32
    %c0_i32_1 = arith.constant 0 : i32
    return %c0_i32, %c0_i32_0 : i32, i32
  }
  func.func @transform_7(%arg0: i32) -> (i32, i32) {
    %c0_i32 = arith.constant 0 : i32
    %c0_i32_0 = arith.constant 0 : i32
    %c0_i32_1 = arith.constant 0 : i32
    return %c0_i32, %c0_i32_0 : i32, i32
  }
  func.func @transform_8(%arg0: i32) -> (i32, i32) {
    %c0_i32 = arith.constant 0 : i32
    %c0_i32_0 = arith.constant 0 : i32
    %c0_i32_1 = arith.constant 0 : i32
    return %c0_i32, %c0_i32_0 : i32, i32
  }
  func.func @transform_9(%arg0: i32) -> (i32, i32) {
    %c0_i32 = arith.constant 0 : i32
    %c0_i32_0 = arith.constant 0 : i32
    %c0_i32_1 = arith.constant 0 : i32
    return %c0_i32, %c0_i32_0 : i32, i32
  }
  func.func @transform_10(%arg0: i32) -> (i32, i32) {
    %c0_i32 = arith.constant 0 : i32
    %c0_i32_0 = arith.constant 0 : i32
    return %arg0, %c0_i32 : i32, i32
  }
  func.func @transform_11(%arg0: i32) -> (i32, i32) {
    %c0_i32 = arith.constant 0 : i32
    %c0_i32_0 = arith.constant 0 : i32
    return %arg0, %c0_i32 : i32, i32
  }
}

</mosaic_0001>

<bundles_post_ra>
// kernel: tpu_custom_call.1
= control target key start
LH: loop header
LB: loop body
LE: loop exit
PB: predicated region body
PF: predicated region fallthrough
CT: control target
= control target key end

     0   :  { %17 = vsyncpa [#allocation3], 0  ;;  %s2247_s0 = inlined_call_operand.vmem [shape: bf16[8,1024], index: 0, kind: input, shape index: {}]   ;;  %s2248_s1 = inlined_call_operand.vmem [shape: f32[8,8], index: 1, kind: input, shape index: {}]   ;;  %s2249_s2 = inlined_call_operand.vmem [shape: bf16[1024,32], index: 2, kind: input, shape index: {}]   ;;  %s2250_s3 = inlined_call_operand.vmem [shape: f32[1,32], index: 3, kind: input, shape index: {}]   ;;  %s2251_s4 = inlined_call_operand.vmem [shape: bf16[32,16], index: 4, kind: input, shape index: {}]   ;;  %s2252_s5 = inlined_call_operand.vmem [shape: f32[1,16], index: 5, kind: input, shape index: {}]   ;;  %s2253_s6 = inlined_call_operand.vmem [shape: bf16[8,32], index: 6, kind: input, shape index: {}]   ;;  %s2254_s7 = inlined_call_operand.vmem [shape: f32[1,32], index: 7, kind: input, shape index: {}]   ;;  %s2255_s8 = inlined_call_operand.vmem [shape: bf16[32,1024], index: 8, kind: input, shape index: {}]   ;;  %s2256_s9 = inlined_call_operand.vmem [shape: f32[1,1024], index: 9, kind: input, shape index: {}]   ;;  %s2257_s10 = inlined_call_operand.hbm [shape: bf16[8,1024], index: 10, kind: output, shape index: {0}]   ;;  %s2258_s11 = inlined_call_operand.hbm [shape: f32[8,24], index: 11, kind: output, shape index: {1}]  }
   0x1   :  { %v1544_v0 = vld [vmem:[%s2249_s2 + $0x38] sm:$0xff]  ;;  %v1543_v4 = vld [vmem:[%s2249_s2 + $0x30] sm:$0xff]  ;;  %v1542_v8 = vld [vmem:[%s2249_s2 + $0x28] sm:$0xff] }
   0x2   :  { %v1552_v1 = vld [vmem:[%s2249_s2 + $0x78] sm:$0xff]  ;;  %589 = vmatpush.bf16.msra.mxu0 %v1544_v0  ;;  %v1551_v5 = vld [vmem:[%s2249_s2 + $0x70] sm:$0xff]  ;;  %v1550_v9 = vld [vmem:[%s2249_s2 + $0x68] sm:$0xff] }
   0x3   :  { %v1560_v2 = vld [vmem:[%s2249_s2 + $0xb8] sm:$0xff]  ;;  %602 = vmatpush.bf16.msra.mxu1 %v1552_v1  ;;  %v1559_v6 = vld [vmem:[%s2249_s2 + $0xb0] sm:$0xff]  ;;  %v1558_v10 = vld [vmem:[%s2249_s2 + $0xa8] sm:$0xff] }
   0x4   :  { %v1568_v3 = vld [vmem:[%s2249_s2 + $0xf8] sm:$0xff]  ;;  %615 = vmatpush.bf16.msra.mxu2 %v1560_v2  ;;  %v1567_v7 = vld [vmem:[%s2249_s2 + $0xf0] sm:$0xff]  ;;  %v1566_v11 = vld [vmem:[%s2249_s2 + $0xe8] sm:$0xff] }
   0x5   :  { %628 = vmatpush.bf16.msra.mxu3 %v1568_v3  ;;  %v1541_v12 = vld [vmem:[%s2249_s2 + $0x20] sm:$0xff]  ;;  %v1540_v16 = vld [vmem:[%s2249_s2 + $0x18] sm:$0xff]  ;;  %v1539_v20 = vld [vmem:[%s2249_s2 + $0x10] sm:$0xff] }
   0x6   :  { %590 = vmatpush.bf16.msra.mxu0 %v1543_v4  ;;  %v1549_v13 = vld [vmem:[%s2249_s2 + $0x60] sm:$0xff]  ;;  %v1548_v17 = vld [vmem:[%s2249_s2 + $0x58] sm:$0xff]  ;;  %v1547_v21 = vld [vmem:[%s2249_s2 + $0x50] sm:$0xff] }
   0x7   :  { %603 = vmatpush.bf16.msra.mxu1 %v1551_v5  ;;  %v1557_v14 = vld [vmem:[%s2249_s2 + $0xa0] sm:$0xff]  ;;  %v1556_v18 = vld [vmem:[%s2249_s2 + $0x98] sm:$0xff]  ;;  %v1555_v22 = vld [vmem:[%s2249_s2 + $0x90] sm:$0xff] }
   0x8   :  { %616 = vmatpush.bf16.msra.mxu2 %v1559_v6  ;;  %v1565_v15 = vld [vmem:[%s2249_s2 + $0xe0] sm:$0xff]  ;;  %v1564_v19 = vld [vmem:[%s2249_s2 + $0xd8] sm:$0xff]  ;;  %v1563_v23 = vld [vmem:[%s2249_s2 + $0xd0] sm:$0xff] }
   0x9   :  { %629 = vmatpush.bf16.msra.mxu3 %v1567_v7 }
   0xa   :  { %591 = vmatpush.bf16.msra.mxu0 %v1542_v8 }
   0xb   :  { %604 = vmatpush.bf16.msra.mxu1 %v1550_v9 }
   0xc   :  { %617 = vmatpush.bf16.msra.mxu2 %v1558_v10 }
   0xd   :  { %630 = vmatpush.bf16.msra.mxu3 %v1566_v11 }
   0xe   :  { %592 = vmatpush.bf16.msra.mxu0 %v1541_v12 }
   0xf   :  { %605 = vmatpush.bf16.msra.mxu1 %v1549_v13 }
  0x10   :  { %618 = vmatpush.bf16.msra.mxu2 %v1557_v14 }
  0x11   :  { %631 = vmatpush.bf16.msra.mxu3 %v1565_v15 }
  0x12   :  { %593 = vmatpush.bf16.msra.mxu0 %v1540_v16 }
  0x13   :  { %606 = vmatpush.bf16.msra.mxu1 %v1548_v17 }
  0x14   :  { %619 = vmatpush.bf16.msra.mxu2 %v1556_v18 }
  0x15   :  { %632 = vmatpush.bf16.msra.mxu3 %v1564_v19 }
  0x16   :  { %18 = vsyncpa [#allocation5], 0  ;;  %594 = vmatpush.bf16.msra.mxu0 %v1539_v20  ;;  %v1538_v24 = vld [vmem:[%s2249_s2 + $0x8] sm:$0xff]  ;;  %v40_v29 = vld [vmem:[%s2247_s0] sm:$0xff]  ;;  %vm715_vm0 = vcmask 261120   ;;  %vm751_vm1 = vcmask 1043456  }
  0x17   :  { %607 = vmatpush.bf16.msra.mxu1 %v1547_v21  ;;  %v1546_v25 = vld [vmem:[%s2249_s2 + $0x48] sm:$0xff]  ;;  %v1537_v30 = vld [vmem:[%s2249_s2] sm:$0xff]  ;;  %v181_v33 = vunpack.c.l.b16 %v40_v29  ;;  %v182_v37 = vunpack.c.h.b16 %v40_v29  ;;  %v1576_v38 = vld [vmem:[%s2249_s2 + $0x138] sm:$0xff]  ;;  %s1712_s26 = smov 120   ;;  %vm747_vm2 = vcmask 64512   ;;  %vm1155_vm3 = vcmask 130048  }
  0x18   :  { %v1554_v26 = vld [vmem:[%s2249_s2 + $0x88] sm:$0xff]  ;;  %620 = vmatpush.bf16.msra.mxu2 %v1555_v22  ;;  %v1545_v31 = vld [vmem:[%s2249_s2 + $0x40] sm:$0xff]  ;;  %v1584_v39 = vld [vmem:[%s2249_s2 + $0x178] sm:$0xff]  ;;  %vm1157_vm4 = vcmask 195584   ;;  %s1177_s22 = sshll.u32 %s2258_s11, 4  ;;  %s1166_s25 = sshll.u32 %s2257_s10, 4  ;;  %s1178_s22 = int_to_ptr.hbm [resolvable:$true] %s1177_s22  ;;  %s1167_s25 = int_to_ptr.hbm [resolvable:$true] %s1166_s25 }
  0x19   :  { %633 = vmatpush.bf16.msra.mxu3 %v1563_v23  ;;  %v1562_v27 = vld [vmem:[%s2249_s2 + $0xc8] sm:$0xff]  ;;  %v1553_v34 = vld [vmem:[%s2249_s2 + $0x80] sm:$0xff]  ;;  %v1592_v40 = vld [vmem:[%s2249_s2 + $0x1b8] sm:$0xff]  ;;  %v189_v43 = vpack.c.b16 %v181_v33, %v181_v33  ;;  %v190_v45 = vpack.c.b16 %v182_v37, %v182_v37 }
  0x1a   :  { %v41_v28 = vld [vmem:[%s2247_s0 + $0x8] sm:$0xff]  ;;  %595 = vmatpush.bf16.msra.mxu0 %v1538_v24  ;;  %v1561_v35 = vld [vmem:[%s2249_s2 + $0xc0] sm:$0xff]  ;;  %v1600_v41 = vld [vmem:[%s2249_s2 + $0x1f8] sm:$0xff] }
  0x1b   :  { %608 = vmatpush.bf16.msra.mxu1 %v1546_v25  ;;  %v183_v32 = vunpack.c.l.b16 %v41_v28  ;;  %v184_v36 = vunpack.c.h.b16 %v41_v28  ;;  %v1575_v46 = vld [vmem:[%s2249_s2 + $0x130] sm:$0xff]  ;;  %v1574_v50 = vld [vmem:[%s2249_s2 + $0x128] sm:$0xff]  ;;  %v1573_v54 = vld [vmem:[%s2249_s2 + $0x120] sm:$0xff] }
  0x1c   :  { %621 = vmatpush.bf16.msra.mxu2 %v1554_v26  ;;  %v1583_v47 = vld [vmem:[%s2249_s2 + $0x170] sm:$0xff]  ;;  %v1582_v51 = vld [vmem:[%s2249_s2 + $0x168] sm:$0xff]  ;;  %v1581_v55 = vld [vmem:[%s2249_s2 + $0x160] sm:$0xff] }
  0x1d   :  { %634 = vmatpush.bf16.msra.mxu3 %v1562_v27  ;;  %v191_v42 = vpack.c.b16 %v183_v32, %v183_v32  ;;  %v192_v44 = vpack.c.b16 %v184_v36, %v184_v36  ;;  %v1591_v48 = vld [vmem:[%s2249_s2 + $0x1b0] sm:$0xff]  ;;  %v1590_v52 = vld [vmem:[%s2249_s2 + $0x1a8] sm:$0xff]  ;;  %v1589_v56 = vld [vmem:[%s2249_s2 + $0x1a0] sm:$0xff] }
  0x1e   :  { %596 = vmatpush.bf16.msra.mxu0 %v1537_v30  ;;  %v1599_v49 = vld [vmem:[%s2249_s2 + $0x1f0] sm:$0xff]  ;;  %v1598_v53 = vld [vmem:[%s2249_s2 + $0x1e8] sm:$0xff]  ;;  %v1597_v57 = vld [vmem:[%s2249_s2 + $0x1e0] sm:$0xff] }
  0x1f   :  { %609 = vmatpush.bf16.msra.mxu1 %v1545_v31  ;;  %v1572_v58 = vld [vmem:[%s2249_s2 + $0x118] sm:$0xff]  ;;  %v1571_v62 = vld [vmem:[%s2249_s2 + $0x110] sm:$0xff]  ;;  %v1570_v2 = vld [vmem:[%s2249_s2 + $0x108] sm:$0xff] }
  0x20   :  { %622 = vmatpush.bf16.msra.mxu2 %v1553_v34  ;;  %v1580_v59 = vld [vmem:[%s2249_s2 + $0x158] sm:$0xff]  ;;  %v1579_v63 = vld [vmem:[%s2249_s2 + $0x150] sm:$0xff]  ;;  %v1578_v3 = vld [vmem:[%s2249_s2 + $0x148] sm:$0xff] }
  0x21   :  { %635 = vmatpush.bf16.msra.mxu3 %v1561_v35  ;;  %597 = vmatmul.bf16.vlgmr.msra.gmra.mxu0 %v189_v43  ;;  %v1588_v60 = vld [vmem:[%s2249_s2 + $0x198] sm:$0xff]  ;;  %v1587_v0 = vld [vmem:[%s2249_s2 + $0x190] sm:$0xff]  ;;  %v1586_v5 = vld [vmem:[%s2249_s2 + $0x188] sm:$0xff] }
  0x22   :  { %641 = vmatpush.bf16.msrb.mxu0 %v1576_v38  ;;  %610 = vmatmul.bf16.vlgmr.msra.gmra.mxu1 %v190_v45  ;;  %v1596_v61 = vld [vmem:[%s2249_s2 + $0x1d8] sm:$0xff]  ;;  %v1595_v1 = vld [vmem:[%s2249_s2 + $0x1d0] sm:$0xff]  ;;  %v1594_v6 = vld [vmem:[%s2249_s2 + $0x1c8] sm:$0xff] }
  0x23   :  { %654 = vmatpush.bf16.msrb.mxu1 %v1584_v39  ;;  %623 = vmatmul.bf16.vlgmr.msra.gmra.mxu2 %v191_v42  ;;  %v42_v4 = vld [vmem:[%s2247_s0 + $0x10] sm:$0xff]  ;;  %v43_v7 = vld [vmem:[%s2247_s0 + $0x18] sm:$0xff]  ;;  %v1569_v10 = vld [vmem:[%s2249_s2 + $0x100] sm:$0xff] }
  0x24   :  { %667 = vmatpush.bf16.msrb.mxu2 %v1592_v40  ;;  %636 = vmatmul.bf16.vlgmr.msra.gmra.mxu3 %v192_v44  ;;  %v185_v8 = vunpack.c.l.b16 %v42_v4  ;;  %v186_v9 = vunpack.c.h.b16 %v42_v4  ;;  %v1577_v11 = vld [vmem:[%s2249_s2 + $0x140] sm:$0xff]  ;;  %v187_v12 = vunpack.c.l.b16 %v43_v7  ;;  %v188_v13 = vunpack.c.h.b16 %v43_v7  ;;  %v1602_v20 = vld [vmem:[%s2251_s4 + $0x8] sm:$0xff] }
  0x25   :  { %680 = vmatpush.bf16.msrb.mxu3 %v1600_v41  ;;  %v1585_v14 = vld [vmem:[%s2249_s2 + $0x180] sm:$0xff]  ;;  %v1499_v4 = vld [vmem:[%s2255_s8 + $0x48] sm:$0xf] }
  0x26   :  { %642 = vmatpush.bf16.msrb.mxu0 %v1575_v46  ;;  %v1593_v15 = vld [vmem:[%s2249_s2 + $0x1c0] sm:$0xff]  ;;  %v193_v16 = vpack.c.b16 %v185_v8, %v185_v8  ;;  %v194_v17 = vpack.c.b16 %v186_v9, %v186_v9  ;;  %v195_v18 = vpack.c.b16 %v187_v12, %v187_v12  ;;  %v196_v19 = vpack.c.b16 %v188_v13, %v188_v13  ;;  %v1612_v8 = vld [vmem:[%s2255_s8 + $0x4c] sm:$0xf] }
  0x27   :  { %655 = vmatpush.bf16.msrb.mxu1 %v1583_v47  ;;  %v1601_v26 = vld [vmem:[%s2251_s4] sm:$0xff]  ;;  %v1501_v9 = vld [vmem:[%s2255_s8 + $0x68] sm:$0xf0] }
  0x28   :  { %668 = vmatpush.bf16.msrb.mxu2 %v1591_v48  ;;  %v1623_v28 = vld [vmem:[%s2250_s3] ss:$0 sm:$0xff]  ;;  %v1603_v13 = vld [vmem:[%s2255_s8 + $0x4] sm:$0xf] }
  0x29   :  { %681 = vmatpush.bf16.msrb.mxu3 %v1599_v49  ;;  %v742_v49 = vld [vmem:[%s2253_s6] sm:$0xf] }
  0x2a   :  { %643 = vmatpush.bf16.msrb.mxu0 %v1574_v50  ;;  %v753_v50 = vsel %vm751_vm1, %v742_v49, 0  ;;  %v1607_v12 = vld [vmem:[%s2255_s8 + $0x1c] sm:$0xf0] }
  0x2b   :  { %656 = vmatpush.bf16.msrb.mxu1 %v1582_v51  ;;  %v1624_v51 = vld [vmem:[%s2252_s5] ss:$0 sm:$0xff]  ;;  %s1713_s5 = smov 16  }
  0x2c   :  { %669 = vmatpush.bf16.msrb.mxu2 %v1590_v52  ;;  %v1625_v49 = vld [vmem:[%s2254_s7] ss:$0 sm:$0xff]  ;;  %s1714_s7 = smov [#allocation4]  }
  0x2d   :  { %682 = vmatpush.bf16.msrb.mxu3 %v1598_v53 }
  0x2e   :  { %644 = vmatpush.bf16.msrb.mxu0 %v1573_v54 }
  0x2f   :  { %657 = vmatpush.bf16.msrb.mxu1 %v1581_v55 }
  0x30   :  { %670 = vmatpush.bf16.msrb.mxu2 %v1589_v56 }
  0x31   :  { %683 = vmatpush.bf16.msrb.mxu3 %v1597_v57 }
  0x32   :  { %645 = vmatpush.bf16.msrb.mxu0 %v1572_v58  ;;  %v44_v58 = vld [vmem:[%s2248_s1] sm:$0xff] }
  0x33   :  { %658 = vmatpush.bf16.msrb.mxu1 %v1580_v59 }
  0x34   :  { %671 = vmatpush.bf16.msrb.mxu2 %v1588_v60 }
  0x35   :  { %684 = vmatpush.bf16.msrb.mxu3 %v1596_v61 }
  0x36   :  { %646 = vmatpush.bf16.msrb.mxu0 %v1571_v62 }
  0x37   :  { %659 = vmatpush.bf16.msrb.mxu1 %v1579_v63  ;;  %v1491_v63 = vld [vmem:[%s2255_s8 + $0x40] sm:$0xf] }
  0x38   :  { %672 = vmatpush.bf16.msrb.mxu2 %v1587_v0  ;;  %v1615_v0 = vld [vmem:[%s2255_s8 + $0x5c] sm:$0xf0] }
  0x39   :  { %685 = vmatpush.bf16.msrb.mxu3 %v1595_v1  ;;  %v1611_v1 = vld [vmem:[%s2255_s8 + $0x44] sm:$0xf] }
  0x3a   :  { %647 = vmatpush.bf16.msrb.mxu0 %v1570_v2  ;;  %v1492_v2 = vor.u32 %v1615_v0, %v1491_v63 }
  0x3b   :  { %660 = vmatpush.bf16.msrb.mxu1 %v1578_v3  ;;  %v1493_v3 = vld [vmem:[%s2255_s8 + $0x60] sm:$0xf0] }
  0x3c   :  { %673 = vmatpush.bf16.msrb.mxu2 %v1586_v5  ;;  %v1616_v5 = vld [vmem:[%s2255_s8 + $0x64] sm:$0xf0] }
  0x3d   :  { %686 = vmatpush.bf16.msrb.mxu3 %v1594_v6  ;;  %v1496_v6 = vor.u32 %v1611_v1, %v1493_v3  ;;  %v1500_v7 = vor.u32 %v1616_v5, %v1499_v4 }
  0x3e   :  { %648 = vmatpush.bf16.msrb.mxu0 %v1569_v10  ;;  %v1459_v10 = vld [vmem:[%s2255_s8] sm:$0xf] }
  0x3f   :  { %661 = vmatpush.bf16.msrb.mxu1 %v1577_v11  ;;  %v1504_v11 = vor.u32 %v1612_v8, %v1501_v9 }
  0x40   :  { %674 = vmatpush.bf16.msrb.mxu2 %v1585_v14  ;;  %v1461_v14 = vld [vmem:[%s2255_s8 + $0x20] sm:$0xf0] }
  0x41   :  { %687 = vmatpush.bf16.msrb.mxu3 %v1593_v15  ;;  %649 = vmatmul.bf16.vlgmr.msrb.gmra.mxu0 %v193_v16  ;;  %v1460_v15 = vor.u32 %v1607_v12, %v1459_v10  ;;  %v1464_v16 = vor.u32 %v1603_v13, %v1461_v14 }
  0x42   :  { %662 = vmatmul.bf16.vlgmr.msrb.gmra.mxu1 %v194_v17  ;;  %725 = vmatpush.bf16.msra.mxu0 %v1602_v20  ;;  %v1467_v17 = vld [vmem:[%s2255_s8 + $0x8] sm:$0xf] }
  0x43   :  { %675 = vmatmul.bf16.vlgmr.msrb.gmra.mxu2 %v195_v18  ;;  %762 = vmatpush.bf16.msra.mxu1 %v753_v50  ;;  %v1608_v18 = vld [vmem:[%s2255_s8 + $0x24] sm:$0xf0] }
  0x44   :  { %688 = vmatmul.bf16.vlgmr.msrb.gmra.mxu3 %v196_v19  ;;  %893 = vmatpush.bf16.msra.mxu2 %v1492_v2  ;;  %v1604_v19 = vld [vmem:[%s2255_s8 + $0xc] sm:$0xf]  ;;  %v1468_v20 = vor.u32 %v1608_v18, %v1467_v17 }
  0x45   :  { %906 = vmatpush.bf16.msra.mxu3 %v1496_v6 }
  0x46   :  { %726 = vmatpush.bf16.msra.mxu0 %v1601_v26 }
  0x47   :  { %932 = vmatpush.bf16.msrb.mxu1 %v1504_v11 }
  0x48   :  { %894 = vmatpush.bf16.msra.mxu2 %v1460_v15 }
  0x49   :  { %907 = vmatpush.bf16.msra.mxu3 %v1464_v16 }
  0x4a   :  { %919 = vmatpush.bf16.msrb.mxu0 %v1500_v7 }
  0x4e   :  { %920 = vmatpush.bf16.msrb.mxu0 %v1468_v20 }
  0x9e   :  { %v598_v21 = vpop.f32.mrf.mxu0 }
  0x9f   :  { %v611_v22 = vpop.f32.mrf.mxu1  ;;  %v599_v31 = vadd.f32 %v1623_v28, %v598_v21  ;;  %v1469_v21 = vld [vmem:[%s2255_s8 + $0x28] sm:$0xf0]  ;;  %v1515_v28 = vld [vmem:[%s2255_s8 + $0x58] sm:$0xf] }
  0xa1   :  { %v612_v32 = vadd.f32 %v611_v22, %v599_v31  ;;  %v1472_v22 = vor.u32 %v1604_v19, %v1469_v21 }
  0xa3   :  { %933 = vmatpush.bf16.msrb.mxu1 %v1472_v22 }
  0xa6   :  { %v624_v23 = vpop.f32.mrf.mxu2  ;;  %v600_v25 = vpop.f32.mrf.mxu0 }
  0xa7   :  { %v637_v24 = vpop.f32.mrf.mxu3  ;;  %v613_v27 = vpop.f32.mrf.mxu1  ;;  %v625_v33 = vadd.f32 %v624_v23, %v612_v32  ;;  %v1507_v23 = vld [vmem:[%s2255_s8 + $0x50] sm:$0xf]  ;;  %v1613_v25 = vld [vmem:[%s2255_s8 + $0x54] sm:$0xf]  ;;  %v1614_v32 = vld [vmem:[%s2255_s8 + $0x5c] sm:$0xf] }
  0xa8   :  { %v1509_v27 = vld [vmem:[%s2255_s8 + $0x70] sm:$0xf0] }
  0xa9   :  { %v638_v34 = vadd.f32 %v637_v24, %v625_v33  ;;  %v1617_v24 = vld [vmem:[%s2255_s8 + $0x6c] sm:$0xf0]  ;;  %v1517_v33 = vld [vmem:[%s2255_s8 + $0x78] sm:$0xf0] }
  0xaa   :  { %v1508_v26 = vor.u32 %v1617_v24, %v1507_v23 }
  0xac   :  { %945 = vmatpush.bf16.msrb.mxu2 %v1508_v26 }
  0xae   :  { %v626_v29 = vpop.f32.mrf.mxu2 }
  0xaf   :  { %v639_v30 = vpop.f32.mrf.mxu3  ;;  %v1618_v29 = vld [vmem:[%s2255_s8 + $0x74] sm:$0xf0] }
  0xb0   :  { %v1512_v30 = vor.u32 %v1613_v25, %v1509_v27  ;;  %v1516_v31 = vor.u32 %v1618_v29, %v1515_v28 }
  0xb2   :  { %958 = vmatpush.bf16.msrb.mxu3 %v1512_v30 }
  0xbe   :  { %v650_v35 = vpop.f32.mrf.mxu0 }
  0xbf   :  { %v663_v36 = vpop.f32.mrf.mxu1  ;;  %v651_v37 = vadd.f32 %v650_v35, %v638_v34  ;;  %v1475_v34 = vld [vmem:[%s2255_s8 + $0x10] sm:$0xf]  ;;  %v1520_v35 = vor.u32 %v1614_v32, %v1517_v33 }
  0xc1   :  { %v664_v38 = vadd.f32 %v663_v36, %v651_v37  ;;  %v1609_v36 = vld [vmem:[%s2255_s8 + $0x2c] sm:$0xf0]  ;;  %v1605_v37 = vld [vmem:[%s2255_s8 + $0x14] sm:$0xf] }
  0xc6   :  { %v676_v39 = vpop.f32.mrf.mxu2  ;;  %v652_v42 = vpop.f32.mrf.mxu0 }
  0xc7   :  { %v689_v40 = vpop.f32.mrf.mxu3  ;;  %v677_v41 = vadd.f32 %v676_v39, %v664_v38  ;;  %v665_v43 = vpop.f32.mrf.mxu1  ;;  %v1477_v38 = vld [vmem:[%s2255_s8 + $0x30] sm:$0xf0]  ;;  %v1476_v39 = vor.u32 %v1609_v36, %v1475_v34  ;;  %v1610_v42 = vld [vmem:[%s2255_s8 + $0x34] sm:$0xf0] }
  0xc8   :  { %v1606_v43 = vld [vmem:[%s2255_s8 + $0x1c] sm:$0xf] }
  0xc9   :  { %v690_v44 = vadd.f32 %v689_v40, %v677_v41  ;;  %v1480_v40 = vor.u32 %v1605_v37, %v1477_v38  ;;  %v1483_v41 = vld [vmem:[%s2255_s8 + $0x18] sm:$0xf]  ;;  %946 = vmatpush.bf16.msrb.mxu2 %v1476_v39 }
  0xcb   :  { %v693_v45 = vmax.f32 %v690_v44, 0.0  ;;  %v1484_v44 = vor.u32 %v1610_v42, %v1483_v41  ;;  %959 = vmatpush.bf16.msrb.mxu3 %v1480_v40 }
  0xcd   :  { %v694_v46 = vpack.c.bf16 %v693_v45, %v693_v45  ;;  %v1485_v45 = vld [vmem:[%s2255_s8 + $0x38] sm:$0xf0]  ;;  %s1175_s8 = sshll.u32 %s1714_s7, 4  ;;  %s1176_s8 = int_to_ptr.vmem [resolvable:$true] %s1175_s8 }
  0xce   :  { %v678_v47 = vpop.f32.mrf.mxu2 }
  0xcf   :  { %v691_v48 = vpop.f32.mrf.mxu3  ;;  %1455 = vmatmul.msk.bf16.vlgmr.msra.gmra.mxu0 %vm715_vm0, %v694_v46  ;;  %v1488_v46 = vor.u32 %v1606_v43, %v1485_v45 }
  0xd0   :  { %971 = vmatpush.bf16.msra.mxu0 %v1516_v31 }
  0xd4   :  { %972 = vmatpush.bf16.msra.mxu0 %v1484_v44 }
 0x14c   :  { %v728_v52 = vpop.f32.mrf.mxu0 }
 0x14d   :  { %v1996_v53 = vadd.f32 %v1624_v51, %v728_v52 }
 0x14f   :  { %v732_v54 = vmul.f32 0.5, %v1996_v53 }
 0x151   :  { %v733_v55 = vmul.f32 1.442695, %v732_v54 }
 0x153   :  { %1626 = vpow2.f32 %v733_v55 }
 0x154   :  { %v730_v56 = vpop.f32.mrf.mxu0 }
 0x159   :  { %v1627_v57 = vpop.eup %1626 }
 0x15a   :  { %736 = vrot.lane.b32.xlu0 %v1627_v57, %s1712_s26 }
 0x1cc   :  { %v737_v59 = vpop.permute.xlu0 %736 }
 0x1cd   :  { %v739_v60 = vmul.f32 %v737_v59, %v44_v58 }
 0x1cf   :  { %v740_v61 = vadd.f32 %v739_v60, %v1996_v53 }
 0x1d1   :  { %v741_v62 = vpack.c.bf16 %v740_v61, %v740_v61  ;;  %1152 = vrot.lane.b32.xlu0 %v740_v61, %s1713_s5 }
 0x1d3   :  { %1456 = vmatmul.msk.bf16.vlgmr.msra.gmra.mxu1 %vm747_vm2, %v741_v62 }
 0x1d4   :  { %984 = vmatpush.bf16.msra.mxu1 %v1520_v35 }
 0x1d8   :  { %985 = vmatpush.bf16.msra.mxu1 %v1488_v46 }
 0x243   :  { %v1153_v47 = vpop.permute.xlu0 %1152 }
 0x244   :  { %v1156_v48 = vsel %vm1155_vm3, %v1996_v53, %v1153_v47  ;;  %v786_v53 = vld [vmem:[%s2256_s9] sm:$0xff]  ;;  %s1715_s9 = smov [#allocation2]  }
 0x245   :  { %1158 = vst.msk [vmem:[#allocation4] sm:$0xff] %vm1157_vm4, %v1156_v48  ;;  %v790_v56 = vperm.slane %v786_v53, 2  ;;  %v791_v57 = vperm.slane %v786_v53, 3  ;;  %v788_v62 = vperm.slane %v786_v53, 0  ;;  %v789_v63 = vperm.slane %v786_v53, 1  ;;  %s1164_s11 = sshll.u32 %s1715_s9, 4  ;;  %s1165_s11 = int_to_ptr.vmem [resolvable:$true] %s1164_s11 }
 0x246   :  { %1180 = dma.vmem_to_hbm [thread:$0]  %s1176_s8, 128, %s1178_s22, [#allocation5]   ;;  %v794_v16 = vperm.slane %v786_v53, 6  ;;  %v795_v17 = vperm.slane %v786_v53, 7  ;;  %v792_v26 = vperm.slane %v786_v53, 4  ;;  %v793_v27 = vperm.slane %v786_v53, 5 }
 0x250   :  { %v764_v50 = vpop.f32.mrf.mxu1 }
 0x251   :  { %v765_v51 = vadd.f32 %v1625_v49, %v764_v50 }
 0x253   :  { %v768_v52 = vmax.f32 %v765_v51, 0.0 }
 0x255   :  { %v769_v54 = vpack.c.bf16 %v768_v52, %v768_v52 }
 0x257   :  { %1521 = vmatmul.msk.bf16.vlgmr.msra.gmra.mxu2 %vm715_vm0, %v769_v54  ;;  %1522 = vmatmul.msk.bf16.vlgmr.msra.gmra.mxu3 %vm715_vm0, %v769_v54 }
 0x258   :  { %1523 = vmatmul.msk.bf16.vlgmr.msrb.gmra.mxu0 %vm715_vm0, %v769_v54  ;;  %1524 = vmatmul.msk.bf16.vlgmr.msrb.gmra.mxu1 %vm715_vm0, %v769_v54  ;;  %v766_v55 = vpop.f32.mrf.mxu1 }
 0x267   :  { %1525 = vmatmul.msk.bf16.vlgmr.msrb.gmra.mxu2 %vm715_vm0, %v769_v54  ;;  %1526 = vmatmul.msk.bf16.vlgmr.msrb.gmra.mxu3 %vm715_vm0, %v769_v54 }
 0x268   :  { %1527 = vmatmul.msk.bf16.vlgmr.msra.gmra.mxu0 %vm715_vm0, %v769_v54  ;;  %1528 = vmatmul.msk.bf16.vlgmr.msra.gmra.mxu1 %vm715_vm0, %v769_v54 }
 0x2d5   :  { %v922_v58 = vpop.f32.mrf.mxu0  ;;  %v935_v59 = vpop.f32.mrf.mxu1 }
 0x2d6   :  { %v923_v60 = vadd.f32 %v922_v58, %v790_v56  ;;  %v936_v61 = vadd.f32 %v935_v59, %v791_v57 }
 0x2d8   :  { %v1531_v0 = vmul.f32 -1.442695, %v923_v60  ;;  %v1532_v1 = vmul.f32 -1.442695, %v936_v61 }
 0x2da   :  { %1628 = vpow2.f32 %v1531_v0  ;;  %v896_v2 = vpop.f32.mrf.mxu2  ;;  %v909_v3 = vpop.f32.mrf.mxu3 }
 0x2db   :  { %1630 = vpow2.f32 %v1532_v1  ;;  %v897_v4 = vadd.f32 %v896_v2, %v788_v62  ;;  %v910_v5 = vadd.f32 %v909_v3, %v789_v63 }
 0x2dd   :  { %v1529_v6 = vmul.f32 -1.442695, %v897_v4  ;;  %v1530_v7 = vmul.f32 -1.442695, %v910_v5  ;;  %v924_v8 = vpop.f32.mrf.mxu0  ;;  %v937_v9 = vpop.f32.mrf.mxu1 }
 0x2df   :  { %1632 = vpow2.f32 %v1529_v6 }
 0x2e0   :  { %v1629_v10 = vpop.eup %1628  ;;  %1634 = vpow2.f32 %v1530_v7 }
 0x2e1   :  { %v1631_v11 = vpop.eup %1630  ;;  %v2117_v12 = vadd.f32 1.0, %v1629_v10 }
 0x2e2   :  { %v2119_v13 = vadd.f32 1.0, %v1631_v11  ;;  %v898_v14 = vpop.f32.mrf.mxu2  ;;  %v911_v15 = vpop.f32.mrf.mxu3 }
 0x2e3   :  { %1636 = vrcp.f32 %v2117_v12  ;;  %vm1058_vm5 = vweird.f32 %v2117_v12  ;;  %v1062_v45 = vand.u32 2147483647, %v2117_v12  ;;  %v1064_v46 = vand.u32 2147483648, %v2117_v12 }
 0x2e4   :  { %1638 = vrcp.f32 %v2119_v13  ;;  %vm1073_vm6 = vweird.f32 %v2119_v13  ;;  %v1077_v47 = vand.u32 2147483647, %v2119_v13  ;;  %v1079_v50 = vand.u32 2147483648, %v2119_v13 }
 0x2e5   :  { %v1633_v18 = vpop.eup %1632  ;;  %v974_v19 = vpop.f32.mrf.mxu0  ;;  %vm2188_vm0 = vcmp.eq.f32.partialorder %v1062_v45, 8.507059e+37 }
 0x2e6   :  { %v987_v20 = vpop.f32.mrf.mxu1  ;;  %v1635_v21 = vpop.eup %1634  ;;  %v2123_v22 = vadd.f32 1.0, %v1633_v18  ;;  %v975_v23 = vadd.f32 %v974_v19, %v794_v16  ;;  %v1065_v16 = vor.u32 1.1754944e-38, %v1064_v46  ;;  %vm1078_vm4 = vcmp.eq.f32.partialorder %v1077_v47, 8.507059e+37 }
 0x2e7   :  { %v988_v24 = vadd.f32 %v987_v20, %v795_v17  ;;  %v2125_v25 = vadd.f32 1.0, %v1635_v21 }
 0x2e8   :  { %1640 = vrcp.f32 %v2123_v22  ;;  %v1535_v28 = vmul.f32 -1.442695, %v975_v23  ;;  %vm1028_vm7 = vweird.f32 %v2123_v22  ;;  %v1034_v58 = vand.u32 2147483648, %v2123_v22 }
 0x2e9   :  { %v1536_v29 = vmul.f32 -1.442695, %v988_v24  ;;  %v2128_v30 = vpop.eup %1636  ;;  %1642 = vrcp.f32 %v2125_v25  ;;  %v1049_v63 = vand.u32 2147483648, %v2125_v25  ;;  %v1032_v8 = vand.u32 2147483647, %v2123_v22 }
 0x2ea   :  { %v2131_v31 = vpop.eup %1638  ;;  %v1054_v32 = vmul.f32 %v2128_v30, %v2117_v12  ;;  %1644 = vpow2.f32 %v1535_v28  ;;  %v948_v33 = vpop.f32.mrf.mxu2  ;;  %vm1059_vm8 = vweird.f32 %v2128_v30  ;;  %vm1043_vm14 = vweird.f32 %v2125_v25 }
 0x2eb   :  { %v961_v34 = vpop.f32.mrf.mxu3  ;;  %v1069_v35 = vmul.f32 %v2131_v31, %v2119_v13  ;;  %1646 = vpow2.f32 %v1536_v29  ;;  %v949_v36 = vadd.f32 %v948_v33, %v792_v26  ;;  %vm1074_vm11 = vweird.f32 %v2131_v31  ;;  %vm2166_vm12 = vmor %vm1058_vm5, %vm1059_vm8 }
 0x2ec   :  { %v962_v37 = vadd.f32 %v961_v34, %v793_v27  ;;  %v1055_v38 = vsub.f32 1.0, %v1054_v32  ;;  %v1047_v9 = vand.u32 2147483647, %v2125_v25  ;;  %v1035_v19 = vor.u32 1.1754944e-38, %v1034_v58  ;;  %vm2201_vm1 = vmor %vm1073_vm6, %vm1074_vm11 }
 0x2ed   :  { %v1070_v39 = vsub.f32 1.0, %v1069_v35  ;;  %v1533_v40 = vmul.f32 -1.442695, %v949_v36  ;;  %v976_v42 = vpop.f32.mrf.mxu0  ;;  %v1050_v20 = vor.u32 1.1754944e-38, %v1049_v63  ;;  %vm1033_vm2 = vcmp.eq.f32.partialorder %v1032_v8, 8.507059e+37 }
 0x2ee   :  { %v1534_v41 = vmul.f32 -1.442695, %v962_v37  ;;  %v989_v43 = vpop.f32.mrf.mxu1  ;;  %v2138_v44 = vpop.eup %1640  ;;  %v1056_v52 = vmul.f32 %v2128_v30, %v1055_v38  ;;  %vm1048_vm3 = vcmp.eq.f32.partialorder %v1047_v9, 8.507059e+37  ;;  %v1080_v13 = vor.u32 1.1754944e-38, %v1079_v50 }
 0x2ef   :  { %v1643_v48 = vpop.eup %1642  ;;  %v1024_v49 = vmul.f32 %v2138_v44, %v2123_v22  ;;  %1648 = vpow2.f32 %v1533_v40  ;;  %v1071_v54 = vmul.f32 %v2131_v31, %v1070_v39  ;;  %vm1029_vm9 = vweird.f32 %v2138_v44 }
 0x2f0   :  { %v1645_v51 = vpop.eup %1644  ;;  %v1039_v55 = vmul.f32 %v1643_v48, %v2125_v25  ;;  %1650 = vpow2.f32 %v1534_v41  ;;  %vm1044_vm10 = vweird.f32 %v1643_v48  ;;  %v1057_v2 = vadd.f32 %v2128_v30, %v1056_v52  ;;  %vm2174_vm13 = vmor %vm1028_vm7, %vm1029_vm9 }
 0x2f1   :  { %v1647_v53 = vpop.eup %1646  ;;  %v1025_v56 = vsub.f32 1.0, %v1024_v49  ;;  %v2151_v57 = vadd.f32 1.0, %v1645_v51  ;;  %v1072_v4 = vadd.f32 %v2131_v31, %v1071_v54  ;;  %vm2184_vm15 = vmor %vm1043_vm14, %vm1044_vm10 }
 0x2f2   :  { %v1040_v59 = vsub.f32 1.0, %v1039_v55  ;;  %v2155_v60 = vadd.f32 1.0, %v1647_v53  ;;  %v950_v61 = vpop.f32.mrf.mxu2  ;;  %v1061_v23 = vsel %vm2166_vm12, %v2128_v30, %v1057_v2 }
 0x2f3   :  { %v963_v62 = vpop.f32.mrf.mxu3  ;;  %v1026_v0 = vmul.f32 %v2138_v44, %v1025_v56  ;;  %1652 = vrcp.f32 %v2151_v57  ;;  %v1076_v24 = vsel %vm2201_vm1, %v2131_v31, %v1072_v4  ;;  %v1066_v30 = vsel %vm2188_vm0, %v1065_v16, %v1061_v23 }
 0x2f4   :  { %v1041_v1 = vmul.f32 %v1643_v48, %v1040_v59  ;;  %1654 = vrcp.f32 %v2155_v60  ;;  %v1081_v33 = vsel %vm1078_vm4, %v1080_v13, %v1076_v24  ;;  %v1122_v31 = vand.u32 2147483647, %v2151_v57 }
 0x2f5   :  { %v1649_v5 = vpop.eup %1648  ;;  %v1027_v6 = vadd.f32 %v2138_v44, %v1026_v0  ;;  %vm1118_vm5 = vweird.f32 %v2151_v57  ;;  %v1124_v35 = vand.u32 2147483648, %v2151_v57  ;;  %vm1133_vm6 = vweird.f32 %v2155_v60 }
 0x2f6   :  { %v1651_v10 = vpop.eup %1650  ;;  %v2181_v11 = vadd.f32 1.0, %v1649_v5  ;;  %v1042_v12 = vadd.f32 %v1643_v48, %v1041_v1  ;;  %v1137_v37 = vand.u32 2147483647, %v2155_v60  ;;  %v1139_v41 = vand.u32 2147483648, %v2155_v60 }
 0x2f7   :  { %v2192_v17 = vadd.f32 1.0, %v1651_v10  ;;  %v1031_v18 = vsel %vm2174_vm13, %v2138_v44, %v1027_v6  ;;  %v1144_v42 = vpack.c.bf16 %v1081_v33, %v1066_v30  ;;  %vm2226_vm8 = vcmp.eq.f32.partialorder %v1122_v31, 8.507059e+37 }
 0x2f8   :  { %1656 = vrcp.f32 %v2181_v11  ;;  %v1046_v22 = vsel %vm2184_vm15, %v1643_v48, %v1042_v12  ;;  %v1036_v28 = vsel %vm1033_vm2, %v1035_v19, %v1031_v18  ;;  %v1092_v48 = vand.u32 2147483647, %v2181_v11 }
 0x2f9   :  { %v1653_v25 = vpop.eup %1652  ;;  %1658 = vrcp.f32 %v2192_v17  ;;  %v1051_v29 = vsel %vm1048_vm3, %v1050_v20, %v1046_v22  ;;  %v1125_v50 = vor.u32 1.1754944e-38, %v1124_v35  ;;  %1148 = vst [vmem:[#allocation2 + $0x8] sm:$0xff] %v1144_v42  ;;  %v1094_v52 = vand.u32 2147483648, %v2181_v11 }
 0x2fa   :  { %v1655_v26 = vpop.eup %1654  ;;  %v1114_v27 = vmul.f32 %v1653_v25, %v2151_v57  ;;  %v1143_v38 = vpack.c.bf16 %v1051_v29, %v1036_v28  ;;  %vm1119_vm7 = vweird.f32 %v1653_v25  ;;  %v1109_v54 = vand.u32 2147483648, %v2192_v17 }
 0x2fb   :  { %v1129_v32 = vmul.f32 %v1655_v26, %v2155_v60  ;;  %vm1134_vm9 = vweird.f32 %v1655_v26  ;;  %vm1120_vm10 = vmor %vm1118_vm5, %vm1119_vm7  ;;  %vm1138_vm12 = vcmp.eq.f32.partialorder %v1137_v37, 8.507059e+37  ;;  %v1140_v58 = vor.u32 1.1754944e-38, %v1139_v41 }
 0x2fc   :  { %v1115_v34 = vsub.f32 1.0, %v1114_v27  ;;  %1147 = vst [vmem:[#allocation2] sm:$0xff] %v1143_v38  ;;  %vm1135_vm11 = vmor %vm1133_vm6, %vm1134_vm9  ;;  %v1107_v0 = vand.u32 2147483647, %v2192_v17  ;;  %vm1088_vm15 = vweird.f32 %v2181_v11  ;;  %v1095_v60 = vor.u32 1.1754944e-38, %v1094_v52 }
 0x2fd   :  { %v1130_v36 = vsub.f32 1.0, %v1129_v32  ;;  %vm1103_vm1 = vweird.f32 %v2192_v17  ;;  %vm1093_vm2 = vcmp.eq.f32.partialorder %v1092_v48, 8.507059e+37  ;;  %v1110_v5 = vor.u32 1.1754944e-38, %v1109_v54 }
 0x2fe   :  { %v1657_v39 = vpop.eup %1656  ;;  %v1116_v40 = vmul.f32 %v1653_v25, %v1115_v34  ;;  %vm1108_vm4 = vcmp.eq.f32.partialorder %v1107_v0, 8.507059e+37 }
 0x2ff   :  { %v1659_v43 = vpop.eup %1658  ;;  %v1131_v44 = vmul.f32 %v1655_v26, %v1130_v36  ;;  %v1084_v45 = vmul.f32 %v1657_v39, %v2181_v11  ;;  %vm1089_vm13 = vweird.f32 %v1657_v39 }
 0x300   :  { %v1099_v47 = vmul.f32 %v1659_v43, %v2192_v17  ;;  %v1117_v49 = vadd.f32 %v1653_v25, %v1116_v40  ;;  %vm1104_vm14 = vweird.f32 %v1659_v43  ;;  %vm1090_vm0 = vmor %vm1088_vm15, %vm1089_vm13 }
 0x301   :  { %v1085_v51 = vsub.f32 1.0, %v1084_v45  ;;  %v1132_v55 = vadd.f32 %v1655_v26, %v1131_v44  ;;  %vm1105_vm3 = vmor %vm1103_vm1, %vm1104_vm14 }
 0x302   :  { %v1100_v53 = vsub.f32 1.0, %v1099_v47  ;;  %v1121_v56 = vsel %vm1120_vm10, %v1653_v25, %v1117_v49 }
 0x303   :  { %v1086_v59 = vmul.f32 %v1657_v39, %v1085_v51  ;;  %v1126_v61 = vsel %vm2226_vm8, %v1125_v50, %v1121_v56  ;;  %v1136_v62 = vsel %vm1135_vm11, %v1655_v26, %v1132_v55 }
 0x304   :  { %v1101_v63 = vmul.f32 %v1659_v43, %v1100_v53  ;;  %v1141_v57 = vsel %vm1138_vm12, %v1140_v58, %v1136_v62 }
 0x305   :  { %v1087_v1 = vadd.f32 %v1657_v39, %v1086_v59  ;;  %v1146_v2 = vpack.c.bf16 %v1141_v57, %v1126_v61 }
 0x306   :  { %v1102_v3 = vadd.f32 %v1659_v43, %v1101_v63 }
 0x307   :  { %v1091_v4 = vsel %vm1090_vm0, %v1657_v39, %v1087_v1  ;;  %1150 = vst [vmem:[#allocation2 + $0x18] sm:$0xff] %v1146_v2 }
 0x308   :  { %v1096_v6 = vsel %vm1093_vm2, %v1095_v60, %v1091_v4  ;;  %v1106_v7 = vsel %vm1105_vm3, %v1659_v43, %v1102_v3 }
 0x309   :  { %v1111_v8 = vsel %vm1108_vm4, %v1110_v5, %v1106_v7 }
 0x30a   :  { %v1145_v9 = vpack.c.bf16 %v1111_v8, %v1096_v6 }
 0x30c   :  { %1149 = vst [vmem:[#allocation2 + $0x10] sm:$0xff] %v1145_v9 }
 0x30d   :  { %1169 = dma.vmem_to_hbm [thread:$0]  %s1165_s11, 512, %s1167_s25, [#allocation3]  }
 0x30e   :  { %1708 = dma.done.wait [#allocation3], 512  }
 0x30f   :  { %1709 = vsyncadd [#allocation3], 4294966784 }
 0x310   :  { %1710 = dma.done.wait [#allocation5], 128  }
 0x311   :  { %1711 = vsyncadd [#allocation5], 4294967168 }
 0x312   :  { %1189 = vsyncpa [#allocation3], 1 }
 0x313   :  { %1190 = vsyncpa [#allocation5], 1 }

</bundles_post_ra>
